<compile_context>
chip_gen: v7x
topology: tpu7x:2x2x1
jax: 0.10.0
libtpu: 0.0.40
codegen_flags: <defaults>
</compile_context>

<pallas_src>
import jax
import jax.numpy as jnp
from jax.experimental import pallas as pl
from jax.experimental.pallas import tpu as pltpu

_FMA_CHANNEL_LIMIT = 16  # use unrolled VPU FMAs when C*C scalar FMAs are cheap


def _pab_kernel_fma(x_ref, w_ref, b_ref, o_ref):
    # x_ref / o_ref : (C, TL)   pixels on the lane axis (VMEM)
    # w_ref         : (C*C,)    conv1x1 weight, row-major (out, in), SMEM f32
    # b_ref         : (C,)      conv1x1 bias, SMEM f32
    C = x_ref.shape[0]
    x = x_ref[...].astype(jnp.float32)                 # (C, TL)

    # Unrolled channel contraction on the VPU: C*C scalar-broadcast FMAs,
    # fully hidden under the HBM DMA for this memory-bound op.
    rows = []
    for co in range(C):
        acc = w_ref[co * C + 0] * x[0:1, :] + b_ref[co]
        for ci in range(1, C):
            acc = acc + w_ref[co * C + ci] * x[ci:ci + 1, :]
        rows.append(acc)
    y = jnp.concatenate(rows, axis=0)                  # (C, TL), f32

    gate = jax.nn.sigmoid(y)                           # EUP transcendental, f32
    o_ref[...] = (gate * x).astype(o_ref.dtype)


def _pab_kernel_dot(x_ref, w_ref, b_ref, o_ref):
    # Fallback for large C: MXU contraction over channels.
    # x_ref/o_ref: (C, TL) VMEM;  w_ref: (C, C) VMEM;  b_ref: (C, 1) VMEM.
    x = x_ref[...]
    y = jnp.dot(w_ref[...], x, preferred_element_type=jnp.float32)
    y = y + b_ref[...].astype(jnp.float32)
    gate = jax.nn.sigmoid(y)
    o_ref[...] = (gate * x.astype(jnp.float32)).astype(o_ref.dtype)


def _padded_sublanes(C, dtype_bytes):
    # Physical sublane padding of a (C, TL) tile: min 8 sublanes for 32-bit,
    # 16 for 16-bit, 32 for 8-bit dtypes.
    sub = 8 if dtype_bytes >= 4 else (16 if dtype_bytes == 2 else 32)
    return ((C + sub - 1) // sub) * sub


def _pick_lane_tile(L, C, dtype_bytes, N, *, target_tile=131072,
                    vmem_io_budget=24 * 1024 * 1024):
    """Largest lane tile (multiple of 128, or the full extent L) such that the
    double-buffered, sublane-PADDED in+out tiles fit a ~24 MiB VMEM I/O budget
    (safe even on v7x's 64 MiB physical / 32 MiB default-scoped VMEM)."""
    pc = _padded_sublanes(C, dtype_bytes)
    per_lane_bytes = 2 * 2 * pc * dtype_bytes        # 2 buffers x (in + out)
    by_budget = max(128, (vmem_io_budget // per_lane_bytes) // 128 * 128)
    tl = min(target_tile, by_budget)
    if L <= tl:
        tl = L                                       # full-extent lane block
    # Keep >= 2 total grid steps so ("parallel","parallel") can shard work
    # across v7x's 2 TensorCores (no-op on single-TC v5e/v6e).
    if N * pl.cdiv(L, tl) < 2 and L > 128:
        tl = max(128, ((pl.cdiv(L, 2) + 127) // 128) * 128)
    return int(tl)


def _pab_call(x3, weight2d, bias1d, tl):
    N, C, L = x3.shape
    grid = (N, pl.cdiv(L, tl))
    dtype_bytes = x3.dtype.itemsize

    # VMEM limit derived from the actual padded, double-buffered tile bytes
    # plus headroom for compiler scratch; capped well under v7x's 64 MiB.
    pc = _padded_sublanes(C, dtype_bytes)
    io_bytes = 2 * 2 * pc * tl * dtype_bytes
    vmem_limit = int(min(max(2 * io_bytes + (4 << 20), 16 << 20), 40 << 20))

    use_fma = C <= _FMA_CHANNEL_LIMIT
    if use_fma:
        kernel = _pab_kernel_fma
        w_arg = weight2d.reshape(C * C).astype(jnp.float32)   # SMEM scalars
        b_arg = bias1d.reshape(C).astype(jnp.float32)
        w_spec = pl.BlockSpec(memory_space=pltpu.MemorySpace.SMEM)
        b_spec = pl.BlockSpec(memory_space=pltpu.MemorySpace.SMEM)
    else:
        kernel = _pab_kernel_dot
        w_arg = weight2d
        b_arg = bias1d.reshape(C, 1)
        w_spec = pl.BlockSpec((C, C), lambda n, t: (0, 0))
        b_spec = pl.BlockSpec((C, 1), lambda n, t: (0, 0))

    cost = pl.CostEstimate(
        flops=2 * N * C * C * L,
        transcendentals=N * C * L,                        # sigmoid
        bytes_accessed=(2 * N * C * L * dtype_bytes       # x read + y write
                        + w_arg.size * w_arg.dtype.itemsize
                        + b_arg.size * b_arg.dtype.itemsize),
    )

    return pl.pallas_call(
        kernel,
        out_shape=jax.ShapeDtypeStruct((N, C, L), x3.dtype),
        grid_spec=pltpu.PrefetchScalarGridSpec(
            num_scalar_prefetch=0,
            grid=grid,
            in_specs=[
                # x tile: batch dim squeezed, full C on sublanes, TL on lanes
                pl.BlockSpec((None, C, tl), lambda n, t: (n, 0, t)),
                w_spec,
                b_spec,
            ],
            out_specs=pl.BlockSpec((None, C, tl), lambda n, t: (n, 0, t)),
        ),
        compiler_params=pltpu.CompilerParams(
            dimension_semantics=("parallel", "parallel"),
            vmem_limit_bytes=vmem_limit,
        ),
        cost_estimate=cost,
    )(x3, w_arg, b_arg)


def pab_forward(x_nchw, weight, bias, *, lane_tile=None):
    """x_nchw: (N, C, H, W); weight: (C_out, C_in, 1, 1); bias: (C_out,)."""
    N, C, H, W = x_nchw.shape
    Cout, Cin = int(weight.shape[0]), int(weight.shape[1])
    assert Cout == C and Cin == C, "PAB uses out_channels==in_channels for conv1x1"

    L = H * W
    x3 = x_nchw.reshape(N, C, L)          # free reshape: NCHW kept, no transpose
    w2d = weight.reshape(C, C)            # (out, in) so y = W @ x
    b1d = bias.reshape(C)

    tl = lane_tile if lane_tile is not None else _pick_lane_tile(
        L, C, x_nchw.dtype.itemsize, N)

    out3 = _pab_call(x3, w2d, b1d, tl)
    return out3.reshape(N, C, H, W)       # free reshape back to NCHW


def _reference_pab(x_nchw, weight, bias):
    # pure-JAX reference of the PyTorch forward
    y = jax.lax.conv_general_dilated(
        x_nchw, weight, window_strides=(1, 1), padding="VALID",
        dimension_numbers=("NCHW", "OIHW", "NCHW"))
    y = y + bias.reshape(1, -1, 1, 1)
    return jax.nn.sigmoid(y) * x_nchw


if __name__ == "__main__":
    key = jax.random.PRNGKey(0)
    k_x, k_w, k_b = jax.random.split(key, 3)

    N, C, H, W = 2, 4, 16, 16
    x = jax.random.normal(k_x, (N, C, H, W), dtype=jnp.float32)

    # deterministic synthetic conv1x1 params (out_channels == in_channels == C)
    weight = jax.random.normal(k_w, (C, C, 1, 1), dtype=jnp.float32) * 0.1
    bias = jax.random.normal(k_b, (C,), dtype=jnp.float32) * 0.1

    out = pab_forward(x, weight, bias)
    out = jax.block_until_ready(out)

    ref = _reference_pab(x, weight, bias)
    assert out.shape == (N, C, H, W)
    assert jnp.allclose(out, ref, atol=1e-5, rtol=1e-5), \
        f"max abs err {jnp.max(jnp.abs(out - ref))}"

    print("KERNEL_OK")
</pallas_src>

<mosaic_0001>
module attributes {stable_mosaic.version = 11 : i64} {
  func.func @_pab_kernel_fma(%arg0: i32, %arg1: i32, %arg2: memref<1x4x256xf32, #tpu.memory_space<vmem>>, %arg3: memref<16xf32, #tpu.memory_space<smem>>, %arg4: memref<4xf32, #tpu.memory_space<smem>>, %arg5: memref<1x4x256xf32, #tpu.memory_space<vmem>>) attributes {dimension_semantics = [#tpu.dimension_semantics<parallel>, #tpu.dimension_semantics<parallel>], iteration_bounds = array<i64: 2, 1>, scalar_prefetch = 0 : i64, scratch_operands = 0 : i64, tpu.core_type = #tpu.core_type<tc>, window_params = [{transform_indices = @transform_0, window_bounds = array<i64: 1, 4, 256>}, {transform_indices = @transform_1, window_bounds = array<i64: 16>}, {transform_indices = @transform_2, window_bounds = array<i64: 4>}, {transform_indices = @transform_3, window_bounds = array<i64: 1, 4, 256>}]} {
    %c0 = arith.constant 0 : index
    %c0_0 = arith.constant 0 : index
    %c0_1 = arith.constant 0 : index
    %0 = vector.load %arg2[%c0, %c0_0, %c0_1] : memref<1x4x256xf32, #tpu.memory_space<vmem>>, vector<1x4x256xf32>
    %1 = vector.shape_cast %0 : vector<1x4x256xf32> to vector<4x256xf32>
    %c0_2 = arith.constant 0 : index
    %2 = memref.load %arg3[%c0_2] : memref<16xf32, #tpu.memory_space<smem>>
    %3 = vector.extract_strided_slice %1 {offsets = [0, 0], sizes = [1, 256], strides = [1, 1]} : vector<4x256xf32> to vector<1x256xf32>
    %4 = vector.broadcast %2 : f32 to vector<1x256xf32>
    %5 = arith.mulf %4, %3 : vector<1x256xf32>
    %c0_3 = arith.constant 0 : index
    %6 = memref.load %arg4[%c0_3] : memref<4xf32, #tpu.memory_space<smem>>
    %7 = vector.broadcast %6 : f32 to vector<1x256xf32>
    %8 = arith.addf %5, %7 : vector<1x256xf32>
    %c1 = arith.constant 1 : index
    %9 = memref.load %arg3[%c1] : memref<16xf32, #tpu.memory_space<smem>>
    %10 = vector.extract_strided_slice %1 {offsets = [1, 0], sizes = [1, 256], strides = [1, 1]} : vector<4x256xf32> to vector<1x256xf32>
    %11 = vector.broadcast %9 : f32 to vector<1x256xf32>
    %12 = arith.mulf %11, %10 : vector<1x256xf32>
    %13 = arith.addf %8, %12 : vector<1x256xf32>
    %c2 = arith.constant 2 : index
    %14 = memref.load %arg3[%c2] : memref<16xf32, #tpu.memory_space<smem>>
    %15 = vector.extract_strided_slice %1 {offsets = [2, 0], sizes = [1, 256], strides = [1, 1]} : vector<4x256xf32> to vector<1x256xf32>
    %16 = vector.broadcast %14 : f32 to vector<1x256xf32>
    %17 = arith.mulf %16, %15 : vector<1x256xf32>
    %18 = arith.addf %13, %17 : vector<1x256xf32>
    %c3 = arith.constant 3 : index
    %19 = memref.load %arg3[%c3] : memref<16xf32, #tpu.memory_space<smem>>
    %20 = vector.extract_strided_slice %1 {offsets = [3, 0], sizes = [1, 256], strides = [1, 1]} : vector<4x256xf32> to vector<1x256xf32>
    %21 = vector.broadcast %19 : f32 to vector<1x256xf32>
    %22 = arith.mulf %21, %20 : vector<1x256xf32>
    %23 = arith.addf %18, %22 : vector<1x256xf32>
    %c4 = arith.constant 4 : index
    %24 = memref.load %arg3[%c4] : memref<16xf32, #tpu.memory_space<smem>>
    %25 = vector.extract_strided_slice %1 {offsets = [0, 0], sizes = [1, 256], strides = [1, 1]} : vector<4x256xf32> to vector<1x256xf32>
    %26 = vector.broadcast %24 : f32 to vector<1x256xf32>
    %27 = arith.mulf %26, %25 : vector<1x256xf32>
    %c1_4 = arith.constant 1 : index
    %28 = memref.load %arg4[%c1_4] : memref<4xf32, #tpu.memory_space<smem>>
    %29 = vector.broadcast %28 : f32 to vector<1x256xf32>
    %30 = arith.addf %27, %29 : vector<1x256xf32>
    %c5 = arith.constant 5 : index
    %31 = memref.load %arg3[%c5] : memref<16xf32, #tpu.memory_space<smem>>
    %32 = vector.extract_strided_slice %1 {offsets = [1, 0], sizes = [1, 256], strides = [1, 1]} : vector<4x256xf32> to vector<1x256xf32>
    %33 = vector.broadcast %31 : f32 to vector<1x256xf32>
    %34 = arith.mulf %33, %32 : vector<1x256xf32>
    %35 = arith.addf %30, %34 : vector<1x256xf32>
    %c6 = arith.constant 6 : index
    %36 = memref.load %arg3[%c6] : memref<16xf32, #tpu.memory_space<smem>>
    %37 = vector.extract_strided_slice %1 {offsets = [2, 0], sizes = [1, 256], strides = [1, 1]} : vector<4x256xf32> to vector<1x256xf32>
    %38 = vector.broadcast %36 : f32 to vector<1x256xf32>
    %39 = arith.mulf %38, %37 : vector<1x256xf32>
    %40 = arith.addf %35, %39 : vector<1x256xf32>
    %c7 = arith.constant 7 : index
    %41 = memref.load %arg3[%c7] : memref<16xf32, #tpu.memory_space<smem>>
    %42 = vector.extract_strided_slice %1 {offsets = [3, 0], sizes = [1, 256], strides = [1, 1]} : vector<4x256xf32> to vector<1x256xf32>
    %43 = vector.broadcast %41 : f32 to vector<1x256xf32>
    %44 = arith.mulf %43, %42 : vector<1x256xf32>
    %45 = arith.addf %40, %44 : vector<1x256xf32>
    %c8 = arith.constant 8 : index
    %46 = memref.load %arg3[%c8] : memref<16xf32, #tpu.memory_space<smem>>
    %47 = vector.extract_strided_slice %1 {offsets = [0, 0], sizes = [1, 256], strides = [1, 1]} : vector<4x256xf32> to vector<1x256xf32>
    %48 = vector.broadcast %46 : f32 to vector<1x256xf32>
    %49 = arith.mulf %48, %47 : vector<1x256xf32>
    %c2_5 = arith.constant 2 : index
    %50 = memref.load %arg4[%c2_5] : memref<4xf32, #tpu.memory_space<smem>>
    %51 = vector.broadcast %50 : f32 to vector<1x256xf32>
    %52 = arith.addf %49, %51 : vector<1x256xf32>
    %c9 = arith.constant 9 : index
    %53 = memref.load %arg3[%c9] : memref<16xf32, #tpu.memory_space<smem>>
    %54 = vector.extract_strided_slice %1 {offsets = [1, 0], sizes = [1, 256], strides = [1, 1]} : vector<4x256xf32> to vector<1x256xf32>
    %55 = vector.broadcast %53 : f32 to vector<1x256xf32>
    %56 = arith.mulf %55, %54 : vector<1x256xf32>
    %57 = arith.addf %52, %56 : vector<1x256xf32>
    %c10 = arith.constant 10 : index
    %58 = memref.load %arg3[%c10] : memref<16xf32, #tpu.memory_space<smem>>
    %59 = vector.extract_strided_slice %1 {offsets = [2, 0], sizes = [1, 256], strides = [1, 1]} : vector<4x256xf32> to vector<1x256xf32>
    %60 = vector.broadcast %58 : f32 to vector<1x256xf32>
    %61 = arith.mulf %60, %59 : vector<1x256xf32>
    %62 = arith.addf %57, %61 : vector<1x256xf32>
    %c11 = arith.constant 11 : index
    %63 = memref.load %arg3[%c11] : memref<16xf32, #tpu.memory_space<smem>>
    %64 = vector.extract_strided_slice %1 {offsets = [3, 0], sizes = [1, 256], strides = [1, 1]} : vector<4x256xf32> to vector<1x256xf32>
    %65 = vector.broadcast %63 : f32 to vector<1x256xf32>
    %66 = arith.mulf %65, %64 : vector<1x256xf32>
    %67 = arith.addf %62, %66 : vector<1x256xf32>
    %c12 = arith.constant 12 : index
    %68 = memref.load %arg3[%c12] : memref<16xf32, #tpu.memory_space<smem>>
    %69 = vector.extract_strided_slice %1 {offsets = [0, 0], sizes = [1, 256], strides = [1, 1]} : vector<4x256xf32> to vector<1x256xf32>
    %70 = vector.broadcast %68 : f32 to vector<1x256xf32>
    %71 = arith.mulf %70, %69 : vector<1x256xf32>
    %c3_6 = arith.constant 3 : index
    %72 = memref.load %arg4[%c3_6] : memref<4xf32, #tpu.memory_space<smem>>
    %73 = vector.broadcast %72 : f32 to vector<1x256xf32>
    %74 = arith.addf %71, %73 : vector<1x256xf32>
    %c13 = arith.constant 13 : index
    %75 = memref.load %arg3[%c13] : memref<16xf32, #tpu.memory_space<smem>>
    %76 = vector.extract_strided_slice %1 {offsets = [1, 0], sizes = [1, 256], strides = [1, 1]} : vector<4x256xf32> to vector<1x256xf32>
    %77 = vector.broadcast %75 : f32 to vector<1x256xf32>
    %78 = arith.mulf %77, %76 : vector<1x256xf32>
    %79 = arith.addf %74, %78 : vector<1x256xf32>
    %c14 = arith.constant 14 : index
    %80 = memref.load %arg3[%c14] : memref<16xf32, #tpu.memory_space<smem>>
    %81 = vector.extract_strided_slice %1 {offsets = [2, 0], sizes = [1, 256], strides = [1, 1]} : vector<4x256xf32> to vector<1x256xf32>
    %82 = vector.broadcast %80 : f32 to vector<1x256xf32>
    %83 = arith.mulf %82, %81 : vector<1x256xf32>
    %84 = arith.addf %79, %83 : vector<1x256xf32>
    %c15 = arith.constant 15 : index
    %85 = memref.load %arg3[%c15] : memref<16xf32, #tpu.memory_space<smem>>
    %86 = vector.extract_strided_slice %1 {offsets = [3, 0], sizes = [1, 256], strides = [1, 1]} : vector<4x256xf32> to vector<1x256xf32>
    %87 = vector.broadcast %85 : f32 to vector<1x256xf32>
    %88 = arith.mulf %87, %86 : vector<1x256xf32>
    %89 = arith.addf %84, %88 : vector<1x256xf32>
    %90 = tpu.concatenate %23, %45, %67, %89 in 0 : vector<1x256xf32>, vector<1x256xf32>, vector<1x256xf32>, vector<1x256xf32> -> vector<4x256xf32>
    %91 = arith.negf %90 : vector<4x256xf32>
    %92 = math.exp %91 : vector<4x256xf32>
    %cst = arith.constant 1.000000e+00 : f32
    %93 = vector.broadcast %cst : f32 to vector<4x256xf32>
    %94 = arith.addf %93, %92 : vector<4x256xf32>
    %95 = arith.divf %93, %94 : vector<4x256xf32>
    %96 = arith.mulf %95, %1 : vector<4x256xf32>
    %c0_7 = arith.constant 0 : index
    %c0_8 = arith.constant 0 : index
    %c0_9 = arith.constant 0 : index
    %97 = vector.load %arg5[%c0_7, %c0_8, %c0_9] : memref<1x4x256xf32, #tpu.memory_space<vmem>>, vector<1x4x256xf32>
    %98 = vector.shape_cast %97 : vector<1x4x256xf32> to vector<4x256xf32>
    %99 = vector.shape_cast %96 : vector<4x256xf32> to vector<1x4x256xf32>
    tpu.vector_store %arg5[%c0_7, %c0_8, %c0_9], %99 {strides = array<i32>} : memref<1x4x256xf32, #tpu.memory_space<vmem>>, vector<1x4x256xf32>,
    return
  }
  func.func @transform_0(%arg0: i32, %arg1: i32) -> (i32, i32, i32) {
    %c0_i32 = arith.constant 0 : i32
    %c0_i32_0 = arith.constant 0 : i32
    return %arg0, %c0_i32, %arg1 : i32, i32, i32
  }
  func.func @transform_1(%arg0: i32, %arg1: i32) -> i32 {
    %c0_i32 = arith.constant 0 : i32
    %c0_i32_0 = arith.constant 0 : i32
    return %c0_i32 : i32
  }
  func.func @transform_2(%arg0: i32, %arg1: i32) -> i32 {
    %c0_i32 = arith.constant 0 : i32
    %c0_i32_0 = arith.constant 0 : i32
    return %c0_i32 : i32
  }
  func.func @transform_3(%arg0: i32, %arg1: i32) -> (i32, i32, i32) {
    %c0_i32 = arith.constant 0 : i32
    %c0_i32_0 = arith.constant 0 : i32
    return %arg0, %c0_i32, %arg1 : i32, i32, i32
  }
}

</mosaic_0001>

<bundles_post_ra>
// kernel: tpu_custom_call.1
= control target key start
LH: loop header
LB: loop body
LE: loop exit
PB: predicated region body
PF: predicated region fallthrough
CT: control target
= control target key end

     0   :  { %8 = vsyncpa [#allocation3], 0  ;;  %s1162_s0 = inlined_call_operand.hbm [shape: f32[2,4,256], index: 0, kind: input, shape index: {}]   ;;  %s1163_s1 = inlined_call_operand.vmem [shape: f32[16], index: 1, kind: input, shape index: {}]   ;;  %s1164_s2 = inlined_call_operand.vmem [shape: f32[4], index: 2, kind: input, shape index: {}]   ;;  %s1165_s3 = inlined_call_operand.hbm [shape: f32[2,4,256], index: 3, kind: output, shape index: {}]  }
   0x1   :  { %10 = vsyncpa [#allocation3 + $0x1], 0 }
   0x2   :  { %11 = vsyncpa [#allocation5], 0 }
   0x3   :  { %12 = vsyncpa [#allocation8], 0 }
   0x4   :  { %13 = vsyncpa [#allocation4], 0 }
   0x5   :  { %15 = vsyncpa [#allocation4 + $0x1], 0  ;;  %s874_s12 = smov 0   ;;  %s876_s13 = smov 0  }
   0x6   :  { %s878_s14 = smov 0   ;;  %s880_s15 = smov 0  }
   0x7   :  { %s882_s16 = smov 0   ;;  %s884_s17 = smov 0  }
   0x8 LB: > { %s553_s18 = sadd.s32 4294967295, %s848_s17   ;;  %s554_s19 = sadd.s32 4294967294, %s848_s17   ;;  %s848_s17 = sphi %s884_s17, %s21_s17   ;;  %s844_s16 = sphi %s882_s16, %s1188_s16   ;;  %s840_s15 = sphi %s880_s15, %s1187_s15   ;;  %s836_s14 = sphi %s878_s14, %s1186_s14   ;;  %s832_s13 = sphi %s876_s13, %s1185_s13   ;;  %s828_s12 = sphi %s874_s12, %s1184_s12  }
   0x9   : > { %p55_p0 = scmp.ne.s32.totalorder %s832_s13, %s828_s12  ;;  %p908_p1 = scmp.eq.s32.totalorder %s553_s18, 0 }
   0xa   : > { %p912_p2 = scmp.eq.s32.totalorder %s553_s18, 1  ;;  %p129_p3 = scmp.eq.s32.totalorder %s554_s19, 1 }
   0xb   : > { %s1170_s20 = scalar_select %p908_p1, 1, 0 }
   0xc   : > { %s1171_s21 = scalar_select %p912_p2, 1, 0 }
   0xd   : > { %p918_p4 = por %p908_p1, %p55_p0  ;;  %p555_p5 = scmp.ge.s32.totalorder %s848_s17, 1 }
   0xe   : > { %p923_p6 = por %p129_p3, %p55_p0  ;;  %p136_p7 = scmp.lt.s32.totalorder %s848_s17, 3 }
   0xf   : > { %s1172_s22 = scalar_select %p918_p4, 1, 0 }
  0x10   : > { %s1173_s23 = scalar_select %p923_p6, 1, 0 }
  0x11   : > { %s149_s26 = sshll.u32 %s1163_s1, 4  ;;  %p931_p8 = pnand %p555_p5, %p136_p7  ;;  %s150_s26 = int_to_ptr.vmem [resolvable:$true] %s149_s26 }
  0x12   : > { %s160_s30 = sshll.u32 %s1164_s2, 4  ;;  %s698_s5 = scalar_lea.vmem %s150_s26, 16  ;;  %s161_s30 = int_to_ptr.vmem [resolvable:$true] %s160_s30 }
  0x13   : > { %s1174_s27 = scalar_select %p931_p8, 1, 0 }
  0x14   : > { %p618_p10 = pneg %p931_p8  ;;  %p699_p12 = scmp.ne.s32.totalorder %s150_s26, %s698_s5 }
  0x15   : > { %p706_p5 = scmp.lt.s32.totalorder %s150_s26, %s150_s26  ;;  %p707_p7 = scmp.lt.s32.totalorder %s698_s5, %s698_s5 }
  0x16   : > { %p943_p11 = pnand %p618_p10, %p908_p1 }
  0x17   : > { %p708_p9 = por %p707_p7, %p706_p5 }
  0x18   : > { %p700_p13 = pneg %p943_p11 }
  0x1a   : > { %p701_p0 = pnand %p700_p13, %p699_p12 }
  0x1c   : > { %p702_p3 = pneg %p701_p0 }
  0x1e   : > { %p709_p6 = pnand %p708_p9, %p702_p3 }
  0x20   : > { %712 = shalt.err (!%p709_p6)
}
  0x21   : > { %s850_s6 = smov [#allocation6]   ;;  %s713_s7 = scalar_lea.vmem %s161_s30, 16 }
  0x22   : > { %621 = dma.vmem_to_smem (!%p943_p11), %s150_s26, 16, %s850_s6, [#allocation5]  }
  0x23   : > { %p714_p10 = scmp.ne.s32.totalorder %s161_s30, %s713_s7  ;;  %p721_p8 = scmp.lt.s32.totalorder %s161_s30, %s161_s30 }
  0x24   : > { %p722_p2 = scmp.lt.s32.totalorder %s713_s7, %s713_s7 }
  0x25   : > { %p716_p1 = pnand %p714_p10, %p700_p13 }
  0x26   : > { %p723_p12 = por %p722_p2, %p721_p8 }
  0x27   : > { %p717_p4 = pneg %p716_p1 }
  0x29   : > { %p724_p0 = pnand %p723_p12, %p717_p4 }
  0x2b   : > { %727 = shalt.err (!%p724_p0)
}
  0x2c   : > { %s851_s8 = smov [#allocation7]   ;;  %s33_s9 = sadd.s32 1, %s844_s16 }
  0x2d   : > { %624 = dma.vmem_to_smem (!%p943_p11), %s161_s30, 16, %s851_s8, [#allocation8]  }
  0x2e   : > { %s42_s10 = sadd.s32 1, %s836_s14  ;;  %p35_p1 = scmp.ge.s32.totalorder %s33_s9, 2 }
  0x2f   : > { %p49_p2 = scmp.ne.s32.totalorder %s836_s14, %s832_s13  ;;  %p50_p4 = scmp.eq.s32.totalorder %s848_s17, 0 }
  0x30   : > { %p635_p6 = scmp.lt.s32.totalorder %s848_s17, 2  ;;  %s1190_s9 = smov (%p35_p1, %s33_s9), 0 }
  0x31   : > { %p51_p8 = por %p50_p4, %p49_p2  ;;  %p1176_p9 = scmp.ne.s32.totalorder %s1171_s21, 0 }
  0x32   : > { %s37_s18 = ssub.s32 %s844_s16, %s1190_s9  ;;  %s171_s19 = sand.u32 1, %s836_s14  }
  0x33   : > { %p963_p13 = por %p1176_p9, %p49_p2  ;;  %p40_p3 = scmp.eq.s32.totalorder %s37_s18, 0 }
  0x34   : > { %s559_s24 = sshll.u32 %s171_s19, 3  ;;  %s604_s25 = sshll.u32 %s844_s16, 7 }
  0x35   : > { %s972_s26 = scalar_select %p40_p3, %s836_s14, %s42_s10  }
  0x36   : > { %s977_s30 = scalar_lea.hbm %s1162_s0, %s604_s25  ;;  %s175_s21 = scalar_lea.vmem [#allocation2], %s559_s24 }
  0x37   : > { %s185_s4 = sshll.u32 %s175_s21, 4  ;;  %p981_p11 = pnand %p635_p6, %p51_p8  ;;  %s985_s4 = int_to_ptr.vmem [resolvable:$true] %s185_s4 }
  0x38   : > { %s172_s6 = scalar_lea.sflag [#allocation3], %s171_s19  ;;  %s728_s7 = scalar_lea.hbm %s977_s30, 128 }
  0x39   : > { %p729_p5 = scmp.ne.s32.totalorder %s977_s30, %s728_s7  ;;  %p730_p7 = pneg %p981_p11 }
  0x3a   : > { %s733_s18 = scalar_lea.hbm %s1162_s0, 256  ;;  %p734_p0 = scmp.lt.u32.totalorder %s977_s30, %s1162_s0 }
  0x3b   : > { %p731_p10 = pnand %p730_p7, %p729_p5  ;;  %p735_p1 = scmp.lt.u32.totalorder %s733_s18, %s728_s7 }
  0x3c   : > { %p737_p4 = scmp.lt.u32.totalorder %s728_s7, %s977_s30 }
  0x3d   : > { %p732_p12 = pneg %p731_p10  ;;  %p736_p2 = por %p735_p1, %p734_p0 }
  0x3f   : > { %p738_p6 = por %p737_p4, %p736_p2 }
  0x41   : > { %p739_p8 = pnand %p738_p6, %p732_p12 }
  0x43   : > { %742 = shalt.err (!%p739_p8)
}
  0x44   : > { %s743_s19 = scalar_lea.vmem %s985_s4, 128  ;;  %s852_s28 = smov [#allocation2]  }
  0x45   : > { %p744_p9 = scmp.ne.s32.totalorder %s985_s4, %s743_s19  ;;  %s748_s29 = sshll.u32 %s852_s28, 4  ;;  %s749_s29 = int_to_ptr.vmem [resolvable:$false] %s748_s29 }
  0x46   : > { %s750_s21 = scalar_lea.vmem %s749_s29, 256  ;;  %p751_p10 = scmp.lt.s32.totalorder %s985_s4, %s749_s29 }
  0x47   : > { %p746_p3 = pnand %p744_p9, %p730_p7  ;;  %p752_p0 = scmp.lt.s32.totalorder %s750_s21, %s743_s19 }
  0x49   : > { %p747_p5 = pneg %p746_p3  ;;  %p753_p1 = por %p752_p0, %p751_p10 }
  0x4b   : > { %p754_p2 = pnand %p753_p1, %p747_p5 }
  0x4d   : > { %757 = shalt.err (!%p754_p2)
}
  0x4e   : > { %628 = dma.hbm_to_vmem [thread:$0]  (!%p981_p11), %s977_s30, 128, %s985_s4, %s172_s6  }
  0x4f   : > { %p1179_p12 = scmp.ne.s32.totalorder %s1174_s27, 0 }
  0x50   : > { %s1015_s7 = sand.u32 (!%p1179_p12), 1, %s832_s13   ;;  %p1180_p7 = scmp.ne.s32.totalorder (!%p1179_p12), %s1172_s22, 0 }
  0x51   : > { %194 = sbr.rel (%p1179_p12) target bundleno = 173 (0xad), region = 32  ;;  %s563_s8 = sshll.u32 (!%p1179_p12), %s1015_s7, 3 }
  0x52   : > { %s197_s10 = scalar_lea.sflag (!%p1179_p12), [#allocation3], %s1015_s7  ;;  %s200_s18 = scalar_lea.vmem (!%p1179_p12), [#allocation2], %s563_s8 }
  0x58   : > { %811 = dma.done.wait (%p1180_p7), %s197_s10, 128  }
  0x59   : > { %813 = vsyncadd (%p1180_p7), %s197_s10, 4294967168  ;;  %p1181_p11 = scmp.ne.s32.totalorder %s1170_s20, 0 }
  0x5b   : > { %815 = dma.done.wait (%p1181_p11), [#allocation5], 16  }
  0x5c   : > { %817 = vsyncadd (%p1181_p11), [#allocation5], 4294967280 }
  0x5d   : > { %819 = dma.done.wait (%p1181_p11), [#allocation8], 16  }
  0x5e   : > { %821 = vsyncadd (%p1181_p11), [#allocation8], 4294967280 }
  0x5f   : > { %213 = sfence }
  0x60   : > { %s235_s27 = sld [smem:[#allocation6]]  ;;  %v356_v0 = vlaneseq  ;;  %s567_s4 = sld [smem:[#allocation6 + $0x1]]  ;;  %v1035_v2 = vld [vmem:[%s200_s18] sm:$0xff]  ;;  %vm399_vm0 = vcmask 1040384   ;;  %vm402_vm1 = vcmask 1041408   ;;  %vm405_vm2 = vcmask 1042432  }
  0x61   : > { %s238_s30 = sld [smem:[#allocation7]]  ;;  %s569_s5 = sld [smem:[#allocation6 + $0x2]] }
  0x62   : > { %s571_s22 = sld [smem:[#allocation6 + $0x3]]  ;;  %s573_s6 = sld [smem:[#allocation6 + $0x4]]  ;;  %v357_v1 = vshrl.u32 %v356_v0, 7 }
  0x63   : > { %s1033_s24 = sld [smem:[#allocation7 + $0x1]]  ;;  %s575_s25 = sld [smem:[#allocation6 + $0x5]] }
  0x64   : > { %s1037_s19 = sld [smem:[#allocation6 + $0x6]]  ;;  %s1039_s28 = sld [smem:[#allocation6 + $0x7]]  ;;  %v1050_v7 = vsub.s32 0, %v357_v1  ;;  %v1055_v11 = vsub.s32 4, %v357_v1 }
  0x65   : > { %s1041_s20 = sld [smem:[#allocation6 + $0x8]]  ;;  %s1043_s29 = sld [smem:[#allocation7 + $0x2]] }
  0x66   : > { %v236_v3 = vstv %s235_s27  ;;  %s1045_s21 = sld [smem:[#allocation6 + $0x9]]  ;;  %v242_v6 = vstv %s567_s4  ;;  %s1048_s10 = sld [smem:[#allocation6 + $0xa]] }
  0x67   : > { %v237_v4 = vmul.f32 %v236_v3, %v1035_v2  ;;  %v239_v5 = vstv %s238_s30  ;;  %v243_v8 = vmul.f32 %v242_v6, %v1035_v2  ;;  %v250_v9 = vstv %s569_s5  ;;  %s1053_s18 = sld [smem:[#allocation6 + $0xb]]  ;;  %s1059_s27 = sld [smem:[#allocation6 + $0xc]] }
  0x68   : > { %v258_v10 = vstv %s571_s22  ;;  %v251_v13 = vmul.f32 %v250_v9, %v1035_v2  ;;  %v266_v15 = vstv %s573_s6  ;;  %s1063_s30 = sld [smem:[#allocation7 + $0x3]]  ;;  %s1065_s4 = sld [smem:[#allocation6 + $0xd]] }
  0x69   : > { %v240_v12 = vadd.f32 %v239_v5, %v237_v4  ;;  %v259_v14 = vmul.f32 %v258_v10, %v1035_v2  ;;  %v568_v16 = vrot.slane %v243_v8, 9  ;;  %v267_v17 = vmul.f32 %v266_v15, %v1035_v2  ;;  %s1071_s5 = sld [smem:[#allocation6 + $0xe]]  ;;  %s1073_s22 = sld [smem:[#allocation6 + $0xf]] }
  0x6a   : > { %v269_v18 = vstv %s1033_s24  ;;  %v272_v19 = vstv %s575_s25  ;;  %v570_v20 = vrot.slane %v251_v13, 10  ;;  %v280_v23 = vstv %s1037_s19  ;;  %s231_s6 = scalar_lea.vmem [#allocation9], %s563_s8  ;;  %s605_s25 = sshll.u32 %s840_s15, 7 }
  0x6b   : > { %v572_v21 = vrot.slane %v259_v14, 11  ;;  %v273_v22 = vmul.f32 %v272_v19, %v1035_v2  ;;  %v248_v24 = vadd.f32 %v568_v16, %v240_v12  ;;  %v270_v25 = vadd.f32 %v269_v18, %v267_v17  ;;  %s447_s24 = sshll.u32 %s231_s6, 4  ;;  %s853_s15 = smov [#allocation9]   ;;  %s1110_s24 = int_to_ptr.vmem [resolvable:$true] %s447_s24 }
  0x6c   : > { %v281_v26 = vmul.f32 %v280_v23, %v1035_v2  ;;  %v288_v27 = vstv %s1039_s28  ;;  %v296_v30 = vstv %s1041_s20  ;;  %v299_v31 = vstv %s1043_s29  ;;  %s1115_s20 = scalar_lea.hbm %s1165_s3, %s605_s25  ;;  %s431_s29 = scalar_lea.sflag [#allocation4], %s1015_s7 }
  0x6d   : > { %v576_v28 = vrot.slane %v273_v22, 9  ;;  %v289_v29 = vmul.f32 %v288_v27, %v1035_v2  ;;  %v256_v32 = vadd.f32 %v570_v20, %v248_v24  ;;  %v297_v34 = vmul.f32 %v296_v30, %v1035_v2  ;;  %s758_s8 = scalar_lea.vmem %s1110_s24, 128 }
  0x6e   : > { %v578_v33 = vrot.slane %v281_v26, 10  ;;  %v302_v35 = vstv %s1045_s21  ;;  %v310_v39 = vstv %s1048_s10  ;;  %v318_v43 = vstv %s1053_s18  ;;  %p759_p4 = scmp.ne.s32.totalorder %s1110_s24, %s758_s8  ;;  %s762_s21 = sshll.u32 %s853_s15, 4  ;;  %s763_s21 = int_to_ptr.vmem [resolvable:$false] %s762_s21 }
  0x6f   : > { %v278_v36 = vadd.f32 %v576_v28, %v270_v25  ;;  %v580_v37 = vrot.slane %v289_v29, 11  ;;  %v303_v38 = vmul.f32 %v302_v35, %v1035_v2  ;;  %v264_v40 = vadd.f32 %v572_v21, %v256_v32  ;;  %s764_s10 = scalar_lea.vmem %s763_s21, 256  ;;  %p765_p9 = scmp.lt.s32.totalorder %s1110_s24, %s763_s21 }
  0x70   : > { %v300_v41 = vadd.f32 %v299_v31, %v297_v34  ;;  %v311_v42 = vmul.f32 %v310_v39, %v1035_v2  ;;  %v319_v46 = vmul.f32 %v318_v43, %v1035_v2  ;;  %v326_v47 = vstv %s1059_s27  ;;  %p760_p6 = pnand %p759_p4, %p963_p13  ;;  %p766_p3 = scmp.lt.s32.totalorder %s764_s10, %s758_s8 }
  0x71   : > { %v286_v44 = vadd.f32 %v578_v33, %v278_v36  ;;  %v584_v45 = vrot.slane %v303_v38, 9  ;;  %v327_v49 = vmul.f32 %v326_v47, %v1035_v2  ;;  %v329_v50 = vstv %s1063_s30 }
  0x72   : > { %v586_v48 = vrot.slane %v311_v42, 10  ;;  %v332_v51 = vstv %s1065_s4  ;;  %v588_v54 = vrot.slane %v319_v46, 11  ;;  %v340_v57 = vstv %s1071_s5  ;;  %p761_p8 = pneg %p760_p6  ;;  %p767_p5 = por %p766_p3, %p765_p9 }
  0x73   : > { %v294_v52 = vadd.f32 %v580_v37, %v286_v44  ;;  %v308_v53 = vadd.f32 %v584_v45, %v300_v41  ;;  %v333_v55 = vmul.f32 %v332_v51, %v1035_v2  ;;  %v330_v56 = vadd.f32 %v329_v50, %v327_v49 }
  0x74   : > { %v348_v58 = vstv %s1073_s22  ;;  %v359_v59 = vrot.slane %v264_v40, %v1050_v7  ;;  %v341_v62 = vmul.f32 %v340_v57, %v1035_v2  ;;  %v363_v0 = vrot.slane %v264_v40, %v1055_v11  ;;  %p768_p10 = pnand %p767_p5, %p761_p8 }
  0x75   : > { %v316_v60 = vadd.f32 %v586_v48, %v308_v53  ;;  %v592_v61 = vrot.slane %v333_v55, 9  ;;  %v349_v63 = vmul.f32 %v348_v58, %v1035_v2  ;;  %v370_v1 = vrot.slane %v294_v52, %v1050_v7 }
  0x76   : > { %v374_v3 = vrot.slane %v294_v52, %v1055_v11  ;;  %v594_v6 = vrot.slane %v341_v62, 10 }
  0x77   : > { %v324_v4 = vadd.f32 %v588_v54, %v316_v60  ;;  %v338_v5 = vadd.f32 %v592_v61, %v330_v56  ;;  %v596_v8 = vrot.slane %v349_v63, 11  ;;  %v400_v9 = vsel %vm399_vm0, %v359_v59, %v370_v1 }
  0x78   : > { %v401_v14 = vsel %vm399_vm0, %v363_v0, %v374_v3 }
  0x79   : > { %v346_v10 = vadd.f32 %v594_v6, %v338_v5  ;;  %v381_v12 = vrot.slane %v324_v4, %v1050_v7  ;;  %v385_v13 = vrot.slane %v324_v4, %v1055_v11 }
  0x7b   : > { %v354_v15 = vadd.f32 %v596_v8, %v346_v10  ;;  %v403_v16 = vsel %vm402_vm1, %v400_v9, %v381_v12  ;;  %v404_v17 = vsel %vm402_vm1, %v401_v14, %v385_v13 }
  0x7d   : > { %v392_v18 = vrot.slane %v354_v15, %v1050_v7  ;;  %v396_v19 = vrot.slane %v354_v15, %v1055_v11  ;;  %v421_v7 = vcombine.high %v1035_v2, %v1035_v2 }
  0x7f   : > { %v406_v20 = vsel %vm405_vm2, %v403_v16, %v392_v18  ;;  %v407_v21 = vsel %vm405_vm2, %v404_v17, %v396_v19 }
  0x80   : > { %v597_v22 = vmul.f32 -1.442695, %v406_v20  ;;  %v598_v23 = vmul.f32 -1.442695, %v407_v21 }
  0x82   : > { %690 = vpow2.f32 %v597_v22 }
  0x83   : > { %692 = vpow2.f32 %v598_v23 }
  0x8c   : > { %v691_v24 = vpop.eup %690 }
  0x8d   : > { %v693_v25 = vpop.eup %692  ;;  %v414_v26 = vadd.f32 1.0, %v691_v24 }
  0x8e   : > { %v415_v27 = vadd.f32 1.0, %v693_v25 }
  0x8f   : > { %694 = vrcp.f32 %v414_v26 }
  0x90   : > { %696 = vrcp.f32 %v415_v27 }
  0x99   : > { %v695_v28 = vpop.eup %694 }
  0x9a   : > { %v697_v11 = vpop.eup %696  ;;  %v423_v29 = vmul.f32 %v695_v28, %v1035_v2 }
  0x9b   : > { %v424_v30 = vmul.f32 %v697_v11, %v421_v7 }
  0x9d   : > { %v427_v31 = vcombine.low %v423_v29, %v424_v30 }
  0x9f   : > { %429 = vst [vmem:[%s231_s6] sm:$0xff] %v427_v31 }
  0xa0   : > { %771 = shalt.err (!%p768_p10)
}
  0xa1   : > { %s772_s7 = scalar_lea.hbm %s1115_s20, 128  ;;  %s776_s30 = scalar_lea.hbm %s1165_s3, 256 }
  0xa2   : > { %p773_p0 = scmp.ne.s32.totalorder %s1115_s20, %s772_s7  ;;  %p777_p12 = scmp.lt.u32.totalorder %s1115_s20, %s1165_s3 }
  0xa3   : > { %p778_p7 = scmp.lt.u32.totalorder %s776_s30, %s772_s7  ;;  %p780_p4 = scmp.lt.u32.totalorder %s772_s7, %s1115_s20 }
  0xa4   : > { %p774_p1 = pnand %p773_p0, %p963_p13 }
  0xa5   : > { %p779_p11 = por %p778_p7, %p777_p12 }
  0xa6   : > { %p775_p2 = pneg %p774_p1 }
  0xa7   : > { %p781_p6 = por %p780_p4, %p779_p11 }
  0xa9   : > { %p782_p8 = pnand %p781_p6, %p775_p2 }
  0xab   : > { %785 = shalt.err (!%p782_p8)
}
  0xac   : > { %616 = dma.vmem_to_hbm [thread:$0]  (%p963_p13), %s1110_s24, 128, %s1115_s20, %s431_s29  }
  0xad PF: > { %s459_s22 = sand.u32 1, %s828_s12   ;;  %p1182_p9 = scmp.ne.s32.totalorder %s1173_s23, 0 }
  0xae   : > { %p1183_p3 = scmp.ge.s32.totalorder %s848_s17, 2  ;;  %s460_s6 = scalar_lea.sflag [#allocation4], %s459_s22 }
  0xb0   : > { %p630_p5 = pnand %p1183_p3, %p1182_p9 }
  0xb2   : > { %823 = dma.done.wait (!%p630_p5), %s460_s6, 128  }
  0xb3   : > { %825 = vsyncadd (!%p630_p5), %s460_s6, 4294967168  ;;  %s21_s17 = sadd.s32 1, %s848_s17   ;;  %s1184_s12 = smov %s832_s13 }
  0xb4   : > { %p18_p10 = scmp.ge.s32.totalorder %s21_s17, 4   ;;  %s1185_s13 = smov %s836_s14 }
  0xb5   : > { %s1186_s14 = smov %s972_s26  ;;  %s1187_s15 = smov %s844_s16 }
  0xb6   : > { %s1188_s16 = smov %s1190_s9  ;;  %20 = sbr.rel (!%p18_p10) target bundleno = 8 (0x8), region = 86 }
  0xbd   :  { %465 = vsyncpa [#allocation3], 1 }
  0xbe   :  { %467 = vsyncpa [#allocation3 + $0x1], 1 }
  0xbf   :  { %468 = vsyncpa [#allocation4], 1 }
  0xc0   :  { %470 = vsyncpa [#allocation4 + $0x1], 1 }
  0xc1   :  { %471 = vsyncpa [#allocation5], 1 }
  0xc2   :  { %473 = vsyncpa [#allocation5 + $0x1], 1 }
  0xc3   :  { %474 = vsyncpa [#allocation8], 1 }

</bundles_post_ra>
